<compile_context>
chip_gen: v5e
topology: v5e:2x2
jax: 0.10.0
libtpu: 0.0.40
codegen_flags: <defaults>
</compile_context>

<pallas_src>
import functools

import jax
import jax.numpy as jnp
from jax import lax
from jax.experimental import pallas as pl
from jax.experimental.pallas import tpu as pltpu

MARGIN = 1.0   # nn.TripletMarginLoss defaults from __init__
P_NORM = 2.0   # only p=2 implemented
EPS = 1e-6

SUBLANE = 8

# Generation-safe budgets: per-step feature-tile target ~6 MiB so the
# double-buffered working set stays well under v5e's 16 MiB default scoped VMEM
# once vmem_limit_bytes is raised, and far under v6e (128 MiB) / v7x (64 MiB)
# physical VMEM.
TILE_TARGET_BYTES = 6 << 20
VMEM_LIMIT_BYTES = 32 << 20

_COMPILER_PARAMS = pltpu.CompilerParams(
    dimension_semantics=("parallel",),
    vmem_limit_bytes=VMEM_LIMIT_BYTES,
)


# --------------------------------------------------------------------------
# small wrapper-side helpers (tile selection)
# --------------------------------------------------------------------------
def _round_up(x, m):
    return (x + m - 1) // m * m


def _auto_tile_n(n, row_bytes, target_bytes=TILE_TARGET_BYTES):
    """Largest multiple-of-8 cluster tile whose per-step traffic is ~target_bytes."""
    row_bytes = max(1, int(row_bytes))
    if 2 * SUBLANE * row_bytes > VMEM_LIMIT_BYTES:
        raise ValueError(
            f"A minimal {SUBLANE}-row tile needs {2 * SUBLANE * row_bytes} bytes "
            f"double-buffered, exceeding the VMEM budget ({VMEM_LIMIT_BYTES} bytes); "
            "reduce cluster_size/feat_dim or raise VMEM_LIMIT_BYTES.")
    rows = max(SUBLANE, (target_bytes // row_bytes) // SUBLANE * SUBLANE)
    return int(min(rows, _round_up(n, SUBLANE)))


def _clamp_tile(tile_n, n):
    return int(min(_round_up(int(tile_n), SUBLANE), _round_up(n, SUBLANE)))


# --------------------------------------------------------------------------
# Kernel 1: per-cluster anchor = mean over the cluster-member axis (axis=1)
# --------------------------------------------------------------------------
def _anchor_mean_kernel(feat_ref, anchors_ref):
    f = feat_ref[...].astype(jnp.float32)                       # (TN, M, D)
    inv_m = 1.0 / feat_ref.shape[1]
    anchors_ref[...] = (jnp.sum(f, axis=1) * inv_m).astype(anchors_ref.dtype)


def compute_anchors(features, *, tile_n=None):
    N, M, D = features.shape
    itemsize = features.dtype.itemsize
    if tile_n is None:
        tile_n = _auto_tile_n(N, (M + 1) * D * itemsize)
    tile_n = _clamp_tile(tile_n, N)
    num_tiles = pl.cdiv(N, tile_n)

    return pl.pallas_call(
        _anchor_mean_kernel,
        out_shape=jax.ShapeDtypeStruct((N, D), features.dtype),
        grid_spec=pltpu.PrefetchScalarGridSpec(
            num_scalar_prefetch=0,
            grid=(num_tiles,),
            in_specs=[pl.BlockSpec((tile_n, M, D), lambda i: (i, 0, 0))],
            out_specs=pl.BlockSpec((tile_n, D), lambda i: (i, 0)),
        ),
        compiler_params=_COMPILER_PARAMS,
    )(features)


# --------------------------------------------------------------------------
# Shared per-tile triplet-loss math (p=2, PyTorch pairwise_distance semantics)
#   d(x, y) = || x - y + eps ||_2
#   Ragged last-tile rows (unspecified data) are masked out only when needed
#   (static check in the wrapper).
# --------------------------------------------------------------------------
def _tile_hinge_sum(a, p, n, *, n_valid, tile_n, ragged):
    d_ap = jnp.sqrt(jnp.sum((a - p + EPS) ** 2, axis=-1, keepdims=True))  # (tn,1)
    d_an = jnp.sqrt(jnp.sum((a - n + EPS) ** 2, axis=-1, keepdims=True))  # (tn,1)
    per_ex = jnp.maximum(d_ap - d_an + MARGIN, 0.0)                       # (tn,1)
    if ragged:
        row = (lax.broadcasted_iota(jnp.int32, per_ex.shape, 0)
               + pl.program_id(0) * tile_n)
        per_ex = jnp.where(row < n_valid, per_ex, 0.0)   # select: kills NaN/garbage
    return jnp.sum(per_ex)


# --------------------------------------------------------------------------
# Kernel 2: TripletMarginLoss(margin=1, p=2, eps=1e-6, swap=False, 'mean')
#           tiled over N; one SMEM partial sum per tile (parallel grid).
# --------------------------------------------------------------------------
def _triplet_partial_kernel(a_ref, p_ref, n_ref, partial_ref, *,
                            n_valid, tile_n, ragged):
    a = a_ref[...].astype(jnp.float32)
    p = p_ref[...].astype(jnp.float32)
    n = n_ref[...].astype(jnp.float32)
    partial_ref[0, 0] = _tile_hinge_sum(a, p, n, n_valid=n_valid,
                                        tile_n=tile_n, ragged=ragged)


def triplet_margin_loss(anchors, positives, negatives, *, tile_n=None):
    N, D = anchors.shape
    itemsize = anchors.dtype.itemsize
    if tile_n is None:
        tile_n = _auto_tile_n(N, 3 * D * itemsize)
    tile_n = _clamp_tile(tile_n, N)
    num_tiles = pl.cdiv(N, tile_n)
    ragged = (N % tile_n) != 0

    vec_spec = pl.BlockSpec((tile_n, D), lambda i: (i, 0))
    partials = pl.pallas_call(
        functools.partial(_triplet_partial_kernel,
                          n_valid=N, tile_n=tile_n, ragged=ragged),
        out_shape=jax.ShapeDtypeStruct((num_tiles, 1), jnp.float32),
        grid_spec=pltpu.PrefetchScalarGridSpec(
            num_scalar_prefetch=0,
            grid=(num_tiles,),
            in_specs=[vec_spec, vec_spec, vec_spec],
            out_specs=pl.BlockSpec((1, 1), lambda i: (i, 0),
                                   memory_space=pltpu.MemorySpace.SMEM),
        ),
        compiler_params=_COMPILER_PARAMS,
    )(anchors, positives, negatives)
    return jnp.sum(partials) * (1.0 / N)   # reduction='mean'


# --------------------------------------------------------------------------
# Kernel 3: fused anchor-mean + triplet loss (avoids the anchors HBM round trip;
#           anchors writeback optional).
# --------------------------------------------------------------------------
def _fused_anchor_loss_kernel(feat_ref, p_ref, n_ref, anchors_ref, partial_ref, *,
                              n_valid, tile_n, ragged):
    f = feat_ref[...].astype(jnp.float32)                       # (TN, M, D)
    a = jnp.sum(f, axis=1) * (1.0 / feat_ref.shape[1])          # (TN, D)
    anchors_ref[...] = a.astype(anchors_ref.dtype)
    p = p_ref[...].astype(jnp.float32)
    n = n_ref[...].astype(jnp.float32)
    partial_ref[0, 0] = _tile_hinge_sum(a, p, n, n_valid=n_valid,
                                        tile_n=tile_n, ragged=ragged)


def _fused_loss_only_kernel(feat_ref, p_ref, n_ref, partial_ref, *,
                            n_valid, tile_n, ragged):
    f = feat_ref[...].astype(jnp.float32)
    a = jnp.sum(f, axis=1) * (1.0 / feat_ref.shape[1])
    p = p_ref[...].astype(jnp.float32)
    n = n_ref[...].astype(jnp.float32)
    partial_ref[0, 0] = _tile_hinge_sum(a, p, n, n_valid=n_valid,
                                        tile_n=tile_n, ragged=ragged)


def fused_anchors_and_triplet_loss(features, positives, negatives, *,
                                   tile_n=None, return_anchors=True):
    N, M, D = features.shape
    itemsize = features.dtype.itemsize
    if tile_n is None:
        tile_n = _auto_tile_n(N, (M + 2 + (1 if return_anchors else 0)) * D * itemsize)
    tile_n = _clamp_tile(tile_n, N)
    num_tiles = pl.cdiv(N, tile_n)
    ragged = (N % tile_n) != 0

    feat_spec = pl.BlockSpec((tile_n, M, D), lambda i: (i, 0, 0))
    vec_spec = pl.BlockSpec((tile_n, D), lambda i: (i, 0))
    partial_spec = pl.BlockSpec((1, 1), lambda i: (i, 0),
                                memory_space=pltpu.MemorySpace.SMEM)

    if return_anchors:
        anchors, partials = pl.pallas_call(
            functools.partial(_fused_anchor_loss_kernel,
                              n_valid=N, tile_n=tile_n, ragged=ragged),
            out_shape=(jax.ShapeDtypeStruct((N, D), features.dtype),
                       jax.ShapeDtypeStruct((num_tiles, 1), jnp.float32)),
            grid_spec=pltpu.PrefetchScalarGridSpec(
                num_scalar_prefetch=0,
                grid=(num_tiles,),
                in_specs=[feat_spec, vec_spec, vec_spec],
                out_specs=(vec_spec, partial_spec),
            ),
            compiler_params=_COMPILER_PARAMS,
        )(features, positives, negatives)
        return anchors, jnp.sum(partials) * (1.0 / N)

    partials = pl.pallas_call(
        functools.partial(_fused_loss_only_kernel,
                          n_valid=N, tile_n=tile_n, ragged=ragged),
        out_shape=jax.ShapeDtypeStruct((num_tiles, 1), jnp.float32),
        grid_spec=pltpu.PrefetchScalarGridSpec(
            num_scalar_prefetch=0,
            grid=(num_tiles,),
            in_specs=[feat_spec, vec_spec, vec_spec],
            out_specs=partial_spec,
        ),
        compiler_params=_COMPILER_PARAMS,
    )(features, positives, negatives)
    return None, jnp.sum(partials) * (1.0 / N)


# --------------------------------------------------------------------------
# Forward wrapper mirroring myTripletloss.forward (as given, it only computes
# anchors; the mining loop is truncated in the reference source).
# --------------------------------------------------------------------------
def my_tripletloss_forward(features, *, tile_n=None):
    anchors = compute_anchors(features, tile_n=tile_n)   # torch.mean(features, 1)
    num_clusters = features.shape[0]                     # noqa: F841 (kept for parity)
    # TODO(synk): positive/negative construction loop in the reference ends at
    # `dis_pow = anchors[i]` and is unfinished — not reproduced here.
    return anchors


if __name__ == "__main__":
    key = jax.random.PRNGKey(0)
    # small shapes: N not a multiple of 8, D not a multiple of 128 on purpose,
    # so the ragged-tail masking path and a multi-step pipelined grid are exercised.
    N, M, D = 30, 8, 96   # (num_clusters, cluster_size, feat_dim)
    features = jax.random.normal(key, (N, M, D), dtype=jnp.float32)

    # synthetic positives / negatives (mining loop truncated in the reference)
    positives = features[:, 0, :]
    negatives = jnp.roll(features[:, 1, :], shift=1, axis=0)

    # small tile so the demo runs a multi-step grid (grid=(4,), ragged last tile)
    anchors = my_tripletloss_forward(features, tile_n=8)
    loss = triplet_margin_loss(anchors, positives, negatives, tile_n=8)
    anchors_f, loss_f = fused_anchors_and_triplet_loss(
        features, positives, negatives, tile_n=8, return_anchors=True)
    _, loss_only = fused_anchors_and_triplet_loss(
        features, positives, negatives, tile_n=8, return_anchors=False)

    anchors, loss, anchors_f, loss_f, loss_only = jax.block_until_ready(
        (anchors, loss, anchors_f, loss_f, loss_only))

    # Pure-JAX reference check (PyTorch TripletMarginLoss semantics, p=2).
    ref_anchors = jnp.mean(features, axis=1)
    ref_d_ap = jnp.sqrt(jnp.sum((ref_anchors - positives + EPS) ** 2, axis=-1))
    ref_d_an = jnp.sqrt(jnp.sum((ref_anchors - negatives + EPS) ** 2, axis=-1))
    ref_loss = jnp.mean(jnp.maximum(ref_d_ap - ref_d_an + MARGIN, 0.0))

    assert jnp.allclose(anchors, ref_anchors, atol=1e-5), "anchor mismatch"
    assert jnp.allclose(anchors_f, ref_anchors, atol=1e-5), "fused anchor mismatch"
    assert jnp.allclose(loss, ref_loss, atol=1e-5), "loss mismatch"
    assert jnp.allclose(loss_f, ref_loss, atol=1e-5), "fused loss mismatch"
    assert jnp.allclose(loss_only, ref_loss, atol=1e-5), "fused loss-only mismatch"

    print("KERNEL_OK")
</pallas_src>

<mosaic_0001>
module attributes {stable_mosaic.version = 11 : i64} {
  func.func @_anchor_mean_kernel(%arg0: i32, %arg1: memref<8x8x96xf32, #tpu.memory_space<vmem>>, %arg2: memref<8x96xf32, #tpu.memory_space<vmem>>) attributes {dimension_semantics = [#tpu.dimension_semantics<parallel>], iteration_bounds = array<i64: 4>, scalar_prefetch = 0 : i64, scratch_operands = 0 : i64, tpu.core_type = #tpu.core_type<tc>, window_params = [{transform_indices = @transform_0, window_bounds = array<i64: 8, 8, 96>}, {transform_indices = @transform_1, window_bounds = array<i64: 8, 96>}]} {
    %c0 = arith.constant 0 : index
    %c0_0 = arith.constant 0 : index
    %c0_1 = arith.constant 0 : index
    %0 = vector.load %arg1[%c0, %c0_0, %c0_1] : memref<8x8x96xf32, #tpu.memory_space<vmem>>, vector<8x8x96xf32>
    %cst = arith.constant dense<0.000000e+00> : vector<8x96xf32>
    %1 = vector.multi_reduction <add>, %0, %cst [1] : vector<8x8x96xf32> to vector<8x96xf32>
    %cst_2 = arith.constant 1.250000e-01 : f32
    %2 = vector.broadcast %cst_2 : f32 to vector<8x96xf32>
    %3 = arith.mulf %1, %2 : vector<8x96xf32>
    %c0_3 = arith.constant 0 : index
    %c0_4 = arith.constant 0 : index
    %4 = vector.load %arg2[%c0_3, %c0_4] : memref<8x96xf32, #tpu.memory_space<vmem>>, vector<8x96xf32>
    tpu.vector_store %arg2[%c0_3, %c0_4], %3 {strides = array<i32>} : memref<8x96xf32, #tpu.memory_space<vmem>>, vector<8x96xf32>,
    return
  }
  func.func @transform_0(%arg0: i32) -> (i32, i32, i32) {
    %c0_i32 = arith.constant 0 : i32
    %c0_i32_0 = arith.constant 0 : i32
    %c0_i32_1 = arith.constant 0 : i32
    return %arg0, %c0_i32, %c0_i32_0 : i32, i32, i32
  }
  func.func @transform_1(%arg0: i32) -> (i32, i32) {
    %c0_i32 = arith.constant 0 : i32
    %c0_i32_0 = arith.constant 0 : i32
    return %arg0, %c0_i32 : i32, i32
  }
}

</mosaic_0001>

<bundles_post_ra>
// kernel: tpu_custom_call.1
= control target key start
LH: loop header
LB: loop body
LE: loop exit
PB: predicated region body
PF: predicated region fallthrough
CT: control target
= control target key end

     0   :  { %6 = vsyncpa [#allocation3], 0  ;;  %s666_s0 = inlined_call_operand.hbm [shape: f32[30,8,96], index: 0, kind: input, shape index: {}]   ;;  %s667_s1 = inlined_call_operand.hbm [shape: f32[30,96], index: 1, kind: output, shape index: {}]  }
   0x1   :  { %8 = vsyncpa [#allocation3 + $0x1], 0 }
   0x2   :  { %9 = vsyncpa [#allocation4], 0 }
   0x3   :  { %11 = vsyncpa [#allocation4 + $0x1], 0  ;;  %s512_s6 = smov 0   ;;  %s514_s7 = smov 0  }
   0x4   :  { %s516_s8 = smov 0   ;;  %s518_s9 = smov 0  }
   0x5 LB: > { %s533_s10 = sadd.s32 4294967295, %s497_s9   ;;  %s332_s11 = sadd.s32 4294967294, %s497_s9   ;;  %s497_s9 = sphi %s518_s9, %s675_s9   ;;  %s493_s8 = sphi %s516_s8, %s674_s8   ;;  %s489_s7 = sphi %s514_s7, %s673_s7   ;;  %s485_s6 = sphi %s512_s6, %s672_s6  }
   0x6   : > { %s537_s12 = sadd.s32 1, %s497_s9   ;;  %s24_s13 = sadd.s32 1, %s493_s8 }
   0x7   : > { %s21_s14 = ssub.s32 %s497_s9, %s537_s12  ;;  %p31_p0 = scmp.ne.s32.totalorder %s493_s8, %s489_s7 }
   0x8   : > { %p22_p1 = scmp.eq.s32.totalorder %s21_s14, 0  ;;  %p32_p2 = scmp.eq.s32.totalorder %s497_s9, 0 }
   0x9   : > { %p37_p3 = scmp.ne.s32.totalorder %s489_s7, %s485_s6  ;;  %p38_p4 = scmp.eq.s32.totalorder %s533_s10, 0 }
   0xa   : > { %s549_s15 = scalar_select %p22_p1, %s493_s8, %s24_s13  }
   0xb   : > { %p33_p5 = por %p32_p2, %p31_p0  ;;  %p551_p6 = por %p38_p4, %p37_p3 }
   0xc   : > { %p61_p7 = scmp.eq.s32.totalorder %s533_s10, 3  ;;  %p67_p8 = scmp.eq.s32.totalorder %s332_s11, 3 }
   0xd   : > { %p334_p11 = scmp.ge.s32.totalorder %s497_s9, 4 }
   0xe   : > { %p556_p9 = por %p61_p7, %p31_p0  ;;  %p560_p10 = por %p67_p8, %p37_p3 }
   0xf   : > { %83 = sbr.rel (%p334_p11) target bundleno = 56 (0x38), region = 16 }
  0x14   : > { %86 = sbr.rel (!%p33_p5) target bundleno = 56 (0x38), region = 20  ;;  %s87_s19 = sand.u32 (%p33_p5), 1, %s493_s8  }
  0x15   : > { %s336_s20 = sshll.u32 (%p33_p5), %s497_s9, 3  ;;  %s335_s21 = sshll.u32 (%p33_p5), %s87_s19, 6 }
  0x16   : > { %s93_s22 = ssub.s32 (%p33_p5), 30, %s336_s20  ;;  %s570_s26 = scalar_lea.sflag (%p33_p5), [#allocation3], %s87_s19 }
  0x17   : > { %p94_p12 = scmp.lt.s32.totalorder (%p33_p5), %s93_s22, 8  ;;  %s91_s27 = scalar_lea.vmem (%p33_p5), [#allocation2], %s335_s21 }
  0x19   : > { %s677_s22 = smov (!%p94_p12, %s93_s22), 8 }
  0x1a   : > { %s337_s23 = sshll.u32 %s677_s22, 3 }
  0x1b   : > { %s97_s24 = ssub.s32 64, %s337_s23 }
  0x1c   : > { %s98_s25 = sshll.u32 %s97_s24, 4 }
  0x1d   : > { %99 = vsyncadd %s570_s26, %s98_s25  ;;  %p573_p13 = scmp.ne.s32.totalorder %s337_s23, 0  ;;  %s349_s29 = sshll.u32 %s497_s9, 6 }
  0x1e   : > { %s102_s3 = scalar_lea.hbm %s666_s0, %s349_s29  ;;  %s581_s4 = sshll.u32 %s91_s27, 4  ;;  %s107_s4 = int_to_ptr.vmem [resolvable:$true] %s581_s4 }
  0x1f   : > { %s104_s5 = sshll.u32 %s102_s3, 4  ;;  %s341_s11 = sshll.u32 %s677_s22, 7  ;;  %s584_s5 = int_to_ptr.hbm [resolvable:$true] %s104_s5 }
  0x20   : > { %s392_s13 = sshra.s32 %s584_s5, 4  ;;  %s394_s14 = sshrl.u32 %s341_s11, 4  ;;  %s393_s13 = int_to_ptr.hbm [resolvable:$true] %s392_s13 }
  0x21   : > { %s399_s19 = scalar_lea.hbm %s393_s13, %s394_s14  ;;  %s403_s23 = scalar_lea.hbm %s666_s0, 240 }
  0x22   : > { %p400_p0 = scmp.ne.s32.totalorder %s393_s13, %s399_s19  ;;  %p404_p3 = scmp.lt.s32.totalorder %s393_s13, %s666_s0 }
  0x23   : > { %p405_p4 = scmp.lt.s32.totalorder %s403_s23, %s399_s19 }
  0x24   : > { %p401_p1 = pnand %p400_p0, %p573_p13 }
  0x25   : > { %p406_p5 = por %p405_p4, %p404_p3 }
  0x26   : > { %p402_p2 = pneg %p401_p1 }
  0x28   : > { %p407_p7 = pnand %p406_p5, %p402_p2 }
  0x2a   : > { %410 = shalt.err (!%p407_p7)
}
  0x2b   : > { %s411_s27 = sshra.s32 %s107_s4, 4  ;;  %s499_s30 = smov [#allocation2]   ;;  %s412_s27 = int_to_ptr.vmem [resolvable:$true] %s411_s27 }
  0x2c   : > { %s418_s29 = scalar_lea.vmem %s412_s27, %s394_s14  ;;  %s422_s2 = scalar_lea.vmem %s499_s30, 128 }
  0x2d   : > { %p419_p8 = scmp.ne.s32.totalorder %s412_s27, %s418_s29  ;;  %p424_p0 = scmp.lt.s32.totalorder %s422_s2, %s418_s29 }
  0x2f   : > { %p420_p11 = pnand %p419_p8, %p573_p13 }
  0x31   : > { %p421_p12 = pneg %p420_p11 }
  0x33   : > { %p426_p1 = pnand %p424_p0, %p421_p12 }
  0x35   : > { %429 = shalt.err (!%p426_p1)
}
  0x36   : > { %s500_s3 = smov 128   ;;  %s501_s13 = smov 8  }
  0x37   : > { %112 = dma.hbm_to_vmem [thread:$0]  (%p573_p13), %s584_s5, %s341_s11, %s107_s4, %s570_s26, %s500_s3, %s500_s3, %s501_s13  }
  0x38 PF: > { %p342_p2 = scmp.ge.s32.totalorder %s497_s9, 1  ;;  %p114_p3 = scmp.lt.s32.totalorder %s497_s9, 5 }
  0x3a   : > { %p115_p4 = pnand %p342_p2, %p114_p3 }
  0x3b   : > { %s613_s14 = sand.u32 (!%p115_p4), 1, %s489_s7  }
  0x3c   : > { %118 = sbr.rel (%p115_p4) target bundleno = 93 (0x5d), region = 24  ;;  %s343_s19 = sshll.u32 (!%p115_p4), %s613_s14, 6 }
  0x3d   : > { %s121_s20 = scalar_lea.sflag (!%p115_p4), [#allocation3], %s613_s14  ;;  %s124_s28 = scalar_lea.vmem (!%p115_p4), [#allocation2], %s343_s19 }
  0x41   : > { %476 = dma.done.wait (%p551_p6), %s121_s20, 1024  }
  0x42   : > { %478 = vsyncadd (%p551_p6), %s121_s20, 4294966272  ;;  %vm157_vm0 = vcmask 785408   ;;  %v149_v0 = vld [vmem:[%s124_s28] sm:$0xff]  ;;  %v150_v1 = vld [vmem:[%s124_s28 + $0x8] sm:$0xff]  ;;  %vm230_vm1 = vcmask 1041409   ;;  %vm232_vm2 = vcmask 1042434  }
  0x43   : > { %v151_v2 = vld [vmem:[%s124_s28 + $0x10] sm:$0xff]  ;;  %v152_v3 = vld [vmem:[%s124_s28 + $0x18] sm:$0xff]  ;;  %v153_v4 = vld [vmem:[%s124_s28 + $0x20] sm:$0xff]  ;;  %v158_v6 = vsel %vm157_vm0, %v149_v0, 0.0  ;;  %v165_v7 = vsel %vm157_vm0, %v150_v1, 0.0  ;;  %vm234_vm3 = vcmask 1043459  }
  0x44   : > { %v154_v5 = vld [vmem:[%s124_s28 + $0x28] sm:$0xff]  ;;  %v172_v8 = vsel %vm157_vm0, %v151_v2, 0.0  ;;  %v155_v9 = vld [vmem:[%s124_s28 + $0x30] sm:$0xff]  ;;  %v156_v10 = vld [vmem:[%s124_s28 + $0x38] sm:$0xff]  ;;  %v159_v11 = vrot.slane %v158_v6, 4  ;;  %v166_v12 = vrot.slane %v165_v7, 4 }
  0x45   : > { %v173_v13 = vrot.slane %v172_v8, 4  ;;  %v179_v14 = vsel %vm157_vm0, %v152_v3, 0.0  ;;  %v186_v16 = vsel %vm157_vm0, %v153_v4, 0.0  ;;  %v193_v17 = vsel %vm157_vm0, %v154_v5, 0.0  ;;  %s344_s16 = sshll.u32 %s613_s14, 3  ;;  %s346_s22 = sshll.u32 %s533_s10, 3 }
  0x46   : > { %v180_v15 = vrot.slane %v179_v14, 4  ;;  %v200_v18 = vsel %vm157_vm0, %v155_v9, 0.0  ;;  %v160_v19 = vadd.f32 %v159_v11, %v158_v6  ;;  %v167_v20 = vadd.f32 %v166_v12, %v165_v7  ;;  %s257_s5 = scalar_lea.hbm %s667_s1, %s346_s22  ;;  %s143_s10 = scalar_lea.vmem [#allocation5], %s344_s16 }
  0x47   : > { %v174_v21 = vadd.f32 %v173_v13, %v172_v8  ;;  %v187_v22 = vrot.slane %v186_v16, 4  ;;  %v194_v24 = vrot.slane %v193_v17, 4  ;;  %v201_v25 = vrot.slane %v200_v18, 4  ;;  %s259_s11 = sshll.u32 %s143_s10, 4  ;;  %s261_s21 = sshll.u32 %s257_s5, 4  ;;  %s260_s11 = int_to_ptr.vmem [resolvable:$true] %s259_s11  ;;  %s262_s21 = int_to_ptr.hbm [resolvable:$true] %s261_s21 }
  0x48   : > { %v181_v23 = vadd.f32 %v180_v15, %v179_v14  ;;  %v207_v26 = vsel %vm157_vm0, %v156_v10, 0.0  ;;  %v161_v27 = vrot.slane %v160_v19, 2  ;;  %v168_v28 = vrot.slane %v167_v20, 2  ;;  %s247_s23 = scalar_lea.sflag [#allocation4], %s613_s14  ;;  %s445_s24 = sshra.s32 %s262_s21, 4  ;;  %s446_s24 = int_to_ptr.hbm [resolvable:$true] %s445_s24 }
  0x49   : > { %v175_v29 = vrot.slane %v174_v21, 2  ;;  %v188_v30 = vadd.f32 %v187_v22, %v186_v16  ;;  %v195_v32 = vadd.f32 %v194_v24, %v193_v17  ;;  %v202_v33 = vadd.f32 %v201_v25, %v200_v18  ;;  %s447_s25 = scalar_lea.hbm %s446_s24, 8  ;;  %s451_s30 = scalar_lea.hbm %s667_s1, 32 }
  0x4a   : > { %v182_v31 = vrot.slane %v181_v23, 2  ;;  %v208_v34 = vrot.slane %v207_v26, 4  ;;  %v162_v35 = vadd.f32 %v161_v27, %v160_v19  ;;  %v169_v36 = vadd.f32 %v168_v28, %v167_v20  ;;  %p448_p6 = scmp.ne.s32.totalorder %s446_s24, %s447_s25  ;;  %p452_p7 = scmp.lt.s32.totalorder %s446_s24, %s667_s1 }
  0x4b   : > { %v176_v37 = vadd.f32 %v175_v29, %v174_v21  ;;  %v189_v38 = vrot.slane %v188_v30, 2  ;;  %v196_v40 = vrot.slane %v195_v32, 2  ;;  %v203_v41 = vrot.slane %v202_v33, 2  ;;  %p453_p8 = scmp.lt.s32.totalorder %s451_s30, %s447_s25 }
  0x4c   : > { %v183_v39 = vadd.f32 %v182_v31, %v181_v23  ;;  %v209_v42 = vadd.f32 %v208_v34, %v207_v26  ;;  %v163_v43 = vrot.slane %v162_v35, 1  ;;  %v170_v44 = vrot.slane %v169_v36, 1  ;;  %p449_p13 = pnand %p448_p6, %p556_p9 }
  0x4d   : > { %v177_v45 = vrot.slane %v176_v37, 1  ;;  %v190_v46 = vadd.f32 %v189_v38, %v188_v30  ;;  %v197_v48 = vadd.f32 %v196_v40, %v195_v32  ;;  %v204_v49 = vadd.f32 %v203_v41, %v202_v33  ;;  %p454_p11 = por %p453_p8, %p452_p7 }
  0x4e   : > { %v184_v47 = vrot.slane %v183_v39, 1  ;;  %v210_v50 = vrot.slane %v209_v42, 2  ;;  %v164_v51 = vadd.f32 %v163_v43, %v162_v35  ;;  %v171_v52 = vadd.f32 %v170_v44, %v169_v36  ;;  %p450_p5 = pneg %p449_p13 }
  0x4f   : > { %v178_v53 = vadd.f32 %v177_v45, %v176_v37  ;;  %v191_v54 = vrot.slane %v190_v46, 1  ;;  %v198_v56 = vrot.slane %v197_v48, 1  ;;  %v205_v57 = vrot.slane %v204_v49, 1 }
  0x50   : > { %v185_v55 = vadd.f32 %v184_v47, %v183_v39  ;;  %v211_v58 = vadd.f32 %v210_v50, %v209_v42  ;;  %v214_v60 = vmul.f32 0.125, %v164_v51  ;;  %v215_v61 = vmul.f32 0.125, %v171_v52  ;;  %p455_p12 = pnand %p454_p11, %p450_p5 }
  0x51   : > { %v192_v59 = vadd.f32 %v191_v54, %v190_v46  ;;  %v216_v62 = vmul.f32 0.125, %v178_v53  ;;  %v199_v63 = vadd.f32 %v198_v56, %v197_v48  ;;  %v206_v0 = vadd.f32 %v205_v57, %v204_v49 }
  0x52   : > { %v212_v1 = vrot.slane %v211_v58, 1  ;;  %v217_v2 = vmul.f32 0.125, %v185_v55  ;;  %v231_v4 = vsel %vm230_vm1, %v215_v61, %v214_v60  ;;  %vm236_vm4 = vcmask 1044484  }
  0x53   : > { %v218_v3 = vmul.f32 0.125, %v192_v59  ;;  %vm238_vm5 = vcmask 1045509   ;;  %v219_v6 = vmul.f32 0.125, %v199_v63  ;;  %v220_v7 = vmul.f32 0.125, %v206_v0 }
  0x54   : > { %v213_v5 = vadd.f32 %v212_v1, %v211_v58  ;;  %v233_v8 = vsel %vm232_vm2, %v216_v62, %v231_v4  ;;  %vm240_vm6 = vcmask 1046534   ;;  %vm242_vm7 = vcmask 1047559  }
  0x55   : > { %v235_v9 = vsel %vm234_vm3, %v217_v2, %v233_v8 }
  0x56   : > { %v221_v10 = vmul.f32 0.125, %v213_v5  ;;  %v237_v11 = vsel %vm236_vm4, %v218_v3, %v235_v9 }
  0x57   : > { %v239_v12 = vsel %vm238_vm5, %v219_v6, %v237_v11 }
  0x58   : > { %v241_v13 = vsel %vm240_vm6, %v220_v7, %v239_v12 }
  0x59   : > { %v243_v14 = vsel %vm242_vm7, %v221_v10, %v241_v13 }
  0x5a   : > { %245 = vst.msk [vmem:[%s143_s10] sm:$0xff] %vm157_vm0, %v243_v14 }
  0x5b   : > { %458 = shalt.err (!%p455_p12)
}
  0x5c   : > { %351 = dma.vmem_to_hbm [thread:$0]  (%p556_p9), %s260_s11, 128, %s262_s21, %s247_s23  }
  0x5d PF: > { %p357_p0 = scmp.ge.s32.totalorder %s497_s9, 2  ;;  %s273_s13 = sand.u32 1, %s485_s6  }
  0x5e   : > { %s274_s14 = scalar_lea.sflag [#allocation4], %s273_s13 }
  0x5f   : > { %p354_p1 = pnand %p357_p0, %p560_p10 }
  0x61   : > { %p355_p2 = pneg %p354_p1 }
  0x63   : > { %480 = dma.done.wait (%p355_p2), %s274_s14, 128  }
  0x64   : > { %482 = vsyncadd (%p355_p2), %s274_s14, 4294967168  ;;  %p14_p3 = scmp.ge.s32.totalorder %s537_s12, 6   ;;  %s672_s6 = smov %s489_s7 }
  0x65   : > { %s673_s7 = smov %s493_s8  ;;  %s674_s8 = smov %s549_s15 }
  0x66   : > { %s675_s9 = smov %s537_s12  ;;  %16 = sbr.rel (!%p14_p3) target bundleno = 5 (0x5), region = 69 }
  0x6b   :  { %280 = vsyncpa [#allocation3], 1 }
  0x6c   :  { %282 = vsyncpa [#allocation3 + $0x1], 1 }
  0x6d   :  { %283 = vsyncpa [#allocation4], 1 }
  0x6e   :  { %285 = vsyncpa [#allocation4 + $0x1], 1 }

</bundles_post_ra>
